<compile_context>
chip_gen: v5e
topology: v5e:2x2
jax: 0.10.0
libtpu: 0.0.40
codegen_flags: <defaults>
</compile_context>

<pallas_src>
import functools

import jax
import jax.numpy as jnp
from jax.experimental import pallas as pl
from jax.experimental.pallas import tpu as pltpu


def mlp_kernel(x_ref, w1_ref, b1_ref, w2_ref, b2_ref, out_ref):
    # fc1: [B, F] @ [F, H1p] + [1, H1p] -> ReLU  (f32 accumulate on MXU, epilogue on VPU)
    h = jnp.dot(x_ref[...], w1_ref[...], preferred_element_type=jnp.float32)
    h = jnp.maximum(h + b1_ref[...], 0.0)
    # fc2: [B, H1p] @ [H1p, Op] + [1, Op]
    y = jnp.dot(h, w2_ref[...], preferred_element_type=jnp.float32)
    out_ref[...] = (y + b2_ref[...]).astype(out_ref.dtype)


def _round_up(n, m):
    return ((n + m - 1) // m) * m


def _pad2(a, shape):
    """Zero-pad a 2-D array up to `shape` (no-op if already that shape)."""
    pr = shape[0] - a.shape[0]
    pc = shape[1] - a.shape[1]
    if pr == 0 and pc == 0:
        return a
    return jnp.pad(a, ((0, pr), (0, pc)))


def prepare_params(w1, b1, w2, b2):
    """One-time (init-time) lane padding of the parameters.

    w1 : [F, H1]   b1 : [H1]
    w2 : [H1, O]   b2 : [O]
    Returns w1p [F, H1p], b1p [1, H1p], w2p [H1p, Op], b2p [1, Op] with
    H1p/Op rounded up to multiples of 128 lanes. The contraction dim F is left
    unpadded so x needs no per-call padding.
    """
    F, H1 = w1.shape
    O = w2.shape[1]
    H1p = _round_up(H1, 128)
    Op = _round_up(O, 128)
    w1p = _pad2(w1, (F, H1p))
    b1p = _pad2(b1.reshape(1, H1), (1, H1p))
    w2p = _pad2(w2, (H1p, Op))
    b2p = _pad2(b2.reshape(1, O), (1, Op))
    return w1p, b1p, w2p, b2p


@functools.partial(jax.jit, static_argnames=("output_size",))
def net_forward(x, w1p, b1p, w2p, b2p, *, output_size):
    """Pallas equivalent of Net.forward.

    x    : [B, C, H, W] float32
    w1p..b2p : pre-padded parameters from prepare_params() (padded ONCE at init)
    returns [B, output_size] float32
    """
    B = x.shape[0]
    F = w1p.shape[0]
    H1p = w1p.shape[1]
    Op = w2p.shape[1]

    x_flat = x.reshape(B, F)  # torch.flatten(x, 1); F matches w1p's contraction dim

    cost = pl.CostEstimate(
        flops=2 * B * (F * H1p + H1p * Op),
        transcendentals=0,
        bytes_accessed=4 * (B * F + F * H1p + H1p + H1p * Op + Op + B * Op),
    )

    out_p = pl.pallas_call(
        mlp_kernel,
        out_shape=jax.ShapeDtypeStruct((B, Op), jnp.float32),
        # No grid: whole arrays live in VMEM for the single invocation, so no
        # (8,128) divisibility requirement on the unpadded B / F dims.
        in_specs=[pl.BlockSpec(memory_space=pltpu.MemorySpace.VMEM)] * 5,
        out_specs=pl.BlockSpec(memory_space=pltpu.MemorySpace.VMEM),
        cost_estimate=cost,
    )(x_flat, w1p, b1p, w2p, b2p)

    # Lane-dense padded slab -> logical [B, output_size] (cheap slice).
    return out_p[:, :output_size]


def init_params(key, input_features, hidden, output_size):
    """Deterministic init mimicking nn.Linear's U(-1/sqrt(fan_in), 1/sqrt(fan_in))."""
    k1, k2, k3, k4 = jax.random.split(key, 4)
    lim1 = 1.0 / jnp.sqrt(jnp.float32(input_features))
    lim2 = 1.0 / jnp.sqrt(jnp.float32(hidden))
    # stored as [in, out] (transposed vs. PyTorch's [out, in])
    w1 = jax.random.uniform(k1, (input_features, hidden), jnp.float32, -lim1, lim1)
    b1 = jax.random.uniform(k2, (hidden,), jnp.float32, -lim1, lim1)
    w2 = jax.random.uniform(k3, (hidden, output_size), jnp.float32, -lim2, lim2)
    b2 = jax.random.uniform(k4, (output_size,), jnp.float32, -lim2, lim2)
    return w1, b1, w2, b2


if __name__ == "__main__":
    key = jax.random.PRNGKey(0)
    kx, kp = jax.random.split(key)

    # Net(input_features=64, hidden_layers=[32], output_size=8)
    B, C, H, W = 2, 4, 4, 4
    input_features = C * H * W  # 64
    hidden = 32
    output_size = 8

    x = jax.random.normal(kx, (B, C, H, W), jnp.float32)
    w1, b1, w2, b2 = init_params(kp, input_features, hidden, output_size)

    # Padding happens here, once, outside the forward path.
    w1p, b1p, w2p, b2p = prepare_params(w1, b1, w2, b2)
    w1p, b1p, w2p, b2p = jax.block_until_ready((w1p, b1p, w2p, b2p))

    out = net_forward(x, w1p, b1p, w2p, b2p, output_size=output_size)
    out = jax.block_until_ready(out)

    # reference check in plain JAX (unpadded params)
    ref = jnp.maximum(x.reshape(B, -1) @ w1 + b1, 0.0) @ w2 + b2
    assert out.shape == (B, output_size)
    assert jnp.allclose(out, ref, atol=1e-5, rtol=1e-5)

    print("KERNEL_OK")
</pallas_src>

<mosaic_0001>
module attributes {stable_mosaic.version = 11 : i64} {
  func.func @mlp_kernel(%arg0: memref<2x64xf32, #tpu.memory_space<vmem>>, %arg1: memref<64x128xf32, #tpu.memory_space<vmem>>, %arg2: memref<1x128xf32, #tpu.memory_space<vmem>>, %arg3: memref<128x128xf32, #tpu.memory_space<vmem>>, %arg4: memref<1x128xf32, #tpu.memory_space<vmem>>, %arg5: memref<2x128xf32, #tpu.memory_space<vmem>>) attributes {dimension_semantics = [], scalar_prefetch = 0 : i64, scratch_operands = 0 : i64, tpu.core_type = #tpu.core_type<tc>} {
    %c0 = arith.constant 0 : index
    %c0_0 = arith.constant 0 : index
    %0 = vector.load %arg0[%c0, %c0_0] : memref<2x64xf32, #tpu.memory_space<vmem>>, vector<2x64xf32>
    %c0_1 = arith.constant 0 : index
    %c0_2 = arith.constant 0 : index
    %1 = vector.load %arg1[%c0_1, %c0_2] : memref<64x128xf32, #tpu.memory_space<vmem>>, vector<64x128xf32>
    %cst = arith.constant dense<0.000000e+00> : vector<2x128xf32>
    %2 = tpu.matmul %0, %1, %cst {dimension_numbers = #tpu.dot_dimension_numbers<[1], [0], [0], [1], [0, 0, 1, 1], [], []>} : vector<2x64xf32>, vector<64x128xf32>, vector<2x128xf32> -> vector<2x128xf32>
    %c0_3 = arith.constant 0 : index
    %c0_4 = arith.constant 0 : index
    %3 = vector.load %arg2[%c0_3, %c0_4] : memref<1x128xf32, #tpu.memory_space<vmem>>, vector<1x128xf32>
    %4 = vector.broadcast %3 : vector<1x128xf32> to vector<2x128xf32>
    %5 = arith.addf %2, %4 : vector<2x128xf32>
    %cst_5 = arith.constant 0.000000e+00 : f32
    %6 = vector.broadcast %cst_5 : f32 to vector<2x128xf32>
    %7 = arith.maximumf %5, %6 : vector<2x128xf32>
    %c0_6 = arith.constant 0 : index
    %c0_7 = arith.constant 0 : index
    %8 = vector.load %arg3[%c0_6, %c0_7] : memref<128x128xf32, #tpu.memory_space<vmem>>, vector<128x128xf32>
    %cst_8 = arith.constant dense<0.000000e+00> : vector<2x128xf32>
    %9 = tpu.matmul %7, %8, %cst_8 {dimension_numbers = #tpu.dot_dimension_numbers<[1], [0], [0], [1], [0, 0, 1, 1], [], []>} : vector<2x128xf32>, vector<128x128xf32>, vector<2x128xf32> -> vector<2x128xf32>
    %c0_9 = arith.constant 0 : index
    %c0_10 = arith.constant 0 : index
    %10 = vector.load %arg4[%c0_9, %c0_10] : memref<1x128xf32, #tpu.memory_space<vmem>>, vector<1x128xf32>
    %11 = vector.broadcast %10 : vector<1x128xf32> to vector<2x128xf32>
    %12 = arith.addf %9, %11 : vector<2x128xf32>
    %c0_11 = arith.constant 0 : index
    %c0_12 = arith.constant 0 : index
    %13 = vector.load %arg5[%c0_11, %c0_12] : memref<2x128xf32, #tpu.memory_space<vmem>>, vector<2x128xf32>
    tpu.vector_store %arg5[%c0_11, %c0_12], %12 {strides = array<i32>} : memref<2x128xf32, #tpu.memory_space<vmem>>, vector<2x128xf32>,
    return
  }
}

</mosaic_0001>

<bundles_post_ra>
// kernel: net_forward.1
= control target key start
LH: loop header
LB: loop body
LE: loop exit
PB: predicated region body
PF: predicated region fallthrough
CT: control target
= control target key end

     0   :  { %10 = vsyncpa [#allocation3], 0  ;;  %s289_s0 = inlined_call_operand.vmem [shape: f32[2,64], index: 0, kind: input, shape index: {}]   ;;  %s290_s1 = inlined_call_operand.hbm [shape: f32[64,128], index: 1, kind: input, shape index: {}]   ;;  %s291_s2 = inlined_call_operand.vmem [shape: f32[1,128], index: 2, kind: input, shape index: {}]   ;;  %s292_s3 = inlined_call_operand.hbm [shape: f32[128,128], index: 3, kind: input, shape index: {}]   ;;  %s293_s4 = inlined_call_operand.vmem [shape: f32[1,128], index: 4, kind: input, shape index: {}]   ;;  %s294_s5 = inlined_call_operand.hbm [shape: f32[2,128], index: 5, kind: output, shape index: {}]  }
   0x1   :  { %11 = vsyncpa [#allocation6], 0 }
   0x2   :  { %12 = vsyncpa [#allocation4], 0  ;;  %s19_s20 = sshll.u32 %s290_s1, 4  ;;  %s236_s21 = smov [#allocation2]   ;;  %s20_s20 = int_to_ptr.hbm [resolvable:$true] %s19_s20 }
   0x3   :  { %s21_s22 = sshll.u32 %s236_s21, 4  ;;  %s34_s25 = sshll.u32 %s292_s3, 4  ;;  %s22_s22 = int_to_ptr.vmem [resolvable:$true] %s21_s22  ;;  %s35_s25 = int_to_ptr.hbm [resolvable:$true] %s34_s25 }
   0x4   :  { %s237_s26 = smov 128   ;;  %s238_s27 = smov 8  }
   0x5   :  { %27 = dma.hbm_to_vmem [thread:$0]  %s20_s20, 1024, %s22_s22, [#allocation3], %s237_s26, %s237_s26, %s238_s27  }
   0x6   :  { %s239_s28 = smov [#allocation5]  }
   0x7   :  { %s36_s29 = sshll.u32 %s239_s28, 4  ;;  %s37_s29 = int_to_ptr.vmem [resolvable:$true] %s36_s29 }
   0x8   :  { %42 = dma.hbm_to_vmem [thread:$0]  %s35_s25, 2048, %s37_s29, [#allocation6], %s237_s26, %s237_s26, %s238_s27  }
   0x9   :  { %230 = dma.done.wait [#allocation3], 1024  }
   0xa   :  { %231 = vsyncadd [#allocation3], 4294966272 }
   0xb   :  { %232 = dma.done.wait [#allocation6], 2048  }
   0xc   :  { %233 = vsyncadd [#allocation6], 4294965248  ;;  %v61_v0 = vld [vmem:[#allocation2 + $0x38] sm:$0xff]  ;;  %v60_v1 = vld [vmem:[#allocation2 + $0x30] sm:$0xff]  ;;  %vm66_vm0 = vcmask 523264   ;;  %s240_s8 = smov [#allocation7]  }
   0xd   :  { %78 = vmatpush.msra.mxu0 %v61_v0  ;;  %v59_v2 = vld [vmem:[#allocation2 + $0x28] sm:$0xff]  ;;  %v106_v3 = vld [vmem:[#allocation5 + $0x78] sm:$0xff]  ;;  %v105_v4 = vld [vmem:[#allocation5 + $0x70] sm:$0xff]  ;;  %s137_s9 = sshll.u32 %s240_s8, 4  ;;  %s139_s12 = sshll.u32 %s294_s5, 4  ;;  %s138_s9 = int_to_ptr.vmem [resolvable:$true] %s137_s9  ;;  %s140_s12 = int_to_ptr.hbm [resolvable:$true] %s139_s12 }
   0xe   :  { %v58_v5 = vld [vmem:[#allocation2 + $0x20] sm:$0xff]  ;;  %111 = vmatpush.msra.mxu1 %v106_v3  ;;  %v104_v6 = vld [vmem:[#allocation5 + $0x68] sm:$0xff]  ;;  %v57_v7 = vld [vmem:[#allocation2 + $0x18] sm:$0xff] }
   0xf   :  { %79 = vmatpush.msra.mxu0 %v60_v1  ;;  %v103_v8 = vld [vmem:[#allocation5 + $0x60] sm:$0xff]  ;;  %v56_v9 = vld [vmem:[#allocation2 + $0x10] sm:$0xff]  ;;  %v102_v10 = vld [vmem:[#allocation5 + $0x58] sm:$0xff] }
  0x10   :  { %112 = vmatpush.msra.mxu1 %v105_v4  ;;  %v55_v11 = vld [vmem:[#allocation2 + $0x8] sm:$0xff]  ;;  %v101_v12 = vld [vmem:[#allocation5 + $0x50] sm:$0xff]  ;;  %v54_v13 = vld [vmem:[#allocation2] sm:$0xff] }
  0x11   :  { %80 = vmatpush.msra.mxu0 %v59_v2  ;;  %v53_v14 = vld [vmem:[%s289_s0] sm:$0x3]  ;;  %v100_v15 = vld [vmem:[#allocation5 + $0x48] sm:$0xff]  ;;  %v98_v17 = vld [vmem:[#allocation5 + $0x38] sm:$0xff] }
  0x12   :  { %113 = vmatpush.msra.mxu1 %v104_v6  ;;  %v99_v16 = vld [vmem:[#allocation5 + $0x40] sm:$0xff]  ;;  %v97_v18 = vld [vmem:[#allocation5 + $0x30] sm:$0xff]  ;;  %v96_v19 = vld [vmem:[#allocation5 + $0x28] sm:$0xff] }
  0x13   :  { %81 = vmatpush.msra.mxu0 %v58_v5  ;;  %v95_v20 = vld [vmem:[#allocation5 + $0x20] sm:$0xff]  ;;  %v94_v21 = vld [vmem:[#allocation5 + $0x18] sm:$0xff]  ;;  %v93_v22 = vld [vmem:[#allocation5 + $0x10] sm:$0xff] }
  0x14   :  { %114 = vmatpush.msra.mxu1 %v103_v8  ;;  %v92_v23 = vld [vmem:[#allocation5 + $0x8] sm:$0xff]  ;;  %v91_v24 = vld [vmem:[#allocation5] sm:$0xff] }
  0x15   :  { %82 = vmatpush.msra.mxu0 %v57_v7  ;;  %v156_v25 = vld [vmem:[%s291_s2] ss:$0 sm:$0xff] }
  0x16   :  { %115 = vmatpush.msra.mxu1 %v102_v10  ;;  %v157_v29 = vld [vmem:[%s293_s4] ss:$0 sm:$0xff] }
  0x17   :  { %83 = vmatpush.msra.mxu0 %v56_v9 }
  0x18   :  { %116 = vmatpush.msra.mxu1 %v101_v12 }
  0x19   :  { %84 = vmatpush.msra.mxu0 %v55_v11 }
  0x1a   :  { %117 = vmatpush.msra.mxu1 %v100_v15 }
  0x1b   :  { %85 = vmatpush.msra.mxu0 %v54_v13 }
  0x1c   :  { %150 = vmatmul.msk.f32.vlgmr.msra.gmra.mxu0 %vm66_vm0, %v53_v14  ;;  %118 = vmatpush.msra.mxu1 %v99_v16 }
  0x1e   :  { %119 = vmatpush.msra.mxu1 %v98_v17 }
  0x20   :  { %120 = vmatpush.msra.mxu1 %v97_v18 }
  0x22   :  { %121 = vmatpush.msra.mxu1 %v96_v19 }
  0x24   :  { %122 = vmatpush.msra.mxu1 %v95_v20 }
  0x26   :  { %123 = vmatpush.msra.mxu1 %v94_v21 }
  0x28   :  { %124 = vmatpush.msra.mxu1 %v93_v22 }
  0x2a   :  { %125 = vmatpush.msra.mxu1 %v92_v23 }
  0x2c   :  { %126 = vmatpush.msra.mxu1 %v91_v24 }
  0x99   :  { %v87_v26 = vpop.f32.mrf.mxu0 }
  0x9a   :  { %v88_v27 = vadd.f32 %v156_v25, %v87_v26 }
  0x9c   :  { %v90_v28 = vmax.f32 %v88_v27, 0.0 }
  0x9e   :  { %127 = vmatmul.f32.vlgmr.msra.gmra.mxu1 %v90_v28 }
 0x11b   :  { %v128_v30 = vpop.f32.mrf.mxu1 }
 0x11c   :  { %v129_v31 = vadd.f32 %v157_v29, %v128_v30 }
 0x11e   :  { %131 = vst [vmem:[#allocation7] sm:$0x3] %v129_v31 }
 0x11f   :  { %142 = dma.vmem_to_hbm [thread:$0]  %s138_s9, 32, %s140_s12, [#allocation4]  }
 0x120   :  { %234 = dma.done.wait [#allocation4], 32  }
 0x121   :  { %235 = vsyncadd [#allocation4], 4294967264 }
 0x122   :  { %147 = vsyncpa [#allocation3], 1 }
 0x123   :  { %148 = vsyncpa [#allocation6], 1 }
 0x124   :  { %149 = vsyncpa [#allocation4], 1 }

</bundles_post_ra>
